<compile_context>
chip_gen: v5e
topology: v5e:2x2
jax: 0.10.0
libtpu: 0.0.40
codegen_flags: <defaults>
</compile_context>

<pallas_src>
import functools

import jax
import jax.numpy as jnp
from jax.experimental import pallas as pl
from jax.experimental.pallas import tpu as pltpu


def _round_up(x, m):
    return (x + m - 1) // m * m


def _cdiv(a, b):
    return (a + b - 1) // b


def _actor_kernel(x_ref, w1_ref, b1_ref, w2_ref, b2_ref,
                  g_ref, beta_ref, w3p_ref, b3p_ref, out_ref,
                  *, inv_temp, eps, action_dim, mm_precision):
    x = x_ref[...]

    # Linear 1 + ReLU (MXU; f32 accumulation regardless of input dtype).
    h1 = jnp.dot(x, w1_ref[...], precision=mm_precision,
                 preferred_element_type=jnp.float32) + b1_ref[...]
    h1 = jnp.maximum(h1, 0.0)

    # Linear 2 + ReLU.
    h2 = jnp.dot(h1.astype(w2_ref.dtype), w2_ref[...], precision=mm_precision,
                 preferred_element_type=jnp.float32) + b2_ref[...]
    h2 = jnp.maximum(h2, 0.0)

    # LayerNorm (PyTorch default: biased variance, eps=1e-5).  The two
    # cross-lane reductions are done on the MXU (idle contraction depth)
    # instead of the XLU: sum(h2) = h2 @ ones, sum(c*c) = (c*c) @ ones.
    hidden = h2.shape[-1]
    w_stat = _round_up(hidden, 128)
    ones_mat = jnp.ones((hidden, w_stat), jnp.float32)
    inv_h = 1.0 / float(hidden)
    mean = jnp.dot(h2, ones_mat, precision=jax.lax.Precision.HIGHEST,
                   preferred_element_type=jnp.float32)[:, :hidden] * inv_h
    centered = h2 - mean
    var = jnp.dot(centered * centered, ones_mat,
                  precision=jax.lax.Precision.HIGHEST,
                  preferred_element_type=jnp.float32)[:, :hidden] * inv_h
    hn = centered * jax.lax.rsqrt(var + eps) * g_ref[...] + beta_ref[...]

    # Output linear against the lane-packed weight slab [w3 | w3]: lanes
    # [0, A) and [A, 2A) both hold the raw logits straight out of the MXU.
    out = jnp.dot(hn.astype(w3p_ref.dtype), w3p_ref[...], precision=mm_precision,
                  preferred_element_type=jnp.float32) + b3p_ref[...]
    out = out * inv_temp                       # reciprocal multiply, not divide

    # tanh (EUP) on the 2A-wide slab, then a lane select: lanes < A keep the
    # raw logits, lanes >= A become tanh(raw).  Single (tb, 2A) store.
    lane = jax.lax.broadcasted_iota(jnp.int32, out.shape, dimension=1)
    out_ref[...] = jnp.where(lane < action_dim, out,
                             jnp.tanh(out)).astype(out_ref.dtype)


def actor_forward(state, params, *, temperature=1.0, return_raw=False,
                  block_batch=1024, use_bf16=False):
    """Pallas forward of the Actor module.

    state:  (B, state_dim) float32
    params: dict with w1 (S,H), b1 (1,H), w2 (H,H), b2 (1,H),
            gamma (1,H), beta (1,H), w3 (H,A), b3 (1,A)
            (weights already transposed to (in, out)).
    Batch all agents/timesteps into one call; per-agent B~2 calls are
    launch-overhead dominated.
    """
    state = jnp.asarray(state, jnp.float32)
    B, S = state.shape
    H = params["w1"].shape[1]
    A = params["w3"].shape[1]
    out_w = 2 * A                                  # [raw | tanh] packed lanes

    # Pack the output projection so both halves come straight out of the MXU.
    w3p = jnp.concatenate([params["w3"], params["w3"]], axis=1)   # (H, 2A)
    b3p = jnp.concatenate([params["b3"], params["b3"]], axis=1)   # (1, 2A)

    # Batch tiling: big tiles (per-step overhead ~0.35us dominates this tiny
    # per-row workload), but at least 2 grid steps whenever B > 8 so the
    # "parallel" batch axis shards across both TensorCores on v7x.  tb is
    # derived from the step count so padding is < 8 rows per step.
    n_steps = max(_cdiv(B, block_batch), min(2, _cdiv(B, 8)))
    tb = _round_up(_cdiv(B, n_steps), 8)
    b_pad = n_steps * tb
    grid = (n_steps,)

    mm_dtype = jnp.bfloat16 if use_bf16 else jnp.float32
    # HIGHEST for the f32 path keeps the 1e-5 match with PyTorch math.
    mm_precision = (jax.lax.Precision.DEFAULT if use_bf16
                    else jax.lax.Precision.HIGHEST)

    x_in = state.astype(mm_dtype)
    if b_pad != B:                                 # at most 7 rows per step
        x_in = jnp.pad(x_in, ((0, b_pad - B), (0, 0)))
    w1 = params["w1"].astype(mm_dtype)
    w2 = params["w2"].astype(mm_dtype)
    w3p_in = w3p.astype(mm_dtype)
    b1 = params["b1"].astype(jnp.float32)
    b2 = params["b2"].astype(jnp.float32)
    gamma = params["gamma"].astype(jnp.float32)
    beta = params["beta"].astype(jnp.float32)
    b3p = b3p.astype(jnp.float32)

    args = (x_in, w1, b1, w2, b2, gamma, beta, w3p_in, b3p)

    # Weights/biases: full-array blocks with constant index maps -> Pallas
    # skips the re-copy when the block index repeats, so they are DMA'd once
    # and stay VMEM-resident.  Only the activation tiles stream.
    def resident(a):
        return pl.BlockSpec(a.shape, lambda i: (0, 0))

    in_specs = ([pl.BlockSpec((tb, S), lambda i: (i, 0))]
                + [resident(a) for a in args[1:]])

    flops = 2 * b_pad * (S * H + H * H + H * out_w + 2 * H)
    transcendentals = b_pad * (out_w + 1)          # tanh slab + rsqrt
    bytes_accessed = (sum(int(a.size) * a.dtype.itemsize for a in args)
                      + b_pad * out_w * 4)

    out = pl.pallas_call(
        functools.partial(_actor_kernel,
                          inv_temp=1.0 / float(temperature),
                          eps=1e-5, action_dim=A, mm_precision=mm_precision),
        out_shape=jax.ShapeDtypeStruct((b_pad, out_w), jnp.float32),
        grid=grid,
        in_specs=in_specs,
        out_specs=pl.BlockSpec((tb, out_w), lambda i: (i, 0)),
        compiler_params=pltpu.CompilerParams(
            dimension_semantics=("parallel",)),
        cost_estimate=pl.CostEstimate(flops=flops,
                                      transcendentals=transcendentals,
                                      bytes_accessed=bytes_accessed),
    )(*args)

    raw = out[:B, :A]
    act = out[:B, A:2 * A]
    if return_raw:
        return raw, act
    return act


def init_actor_params(key, state_dim, action_dim, hidden_size=64):
    """Deterministic init mirroring PyTorch nn.Linear defaults + the
    uniform_(-0.003, 0.003) override on the last layer's weight."""
    ks = jax.random.split(key, 6)

    def linear(kw, kb, fan_in, fan_out):
        bound = 1.0 / jnp.sqrt(fan_in)
        # stored transposed: (in, out)
        w = jax.random.uniform(kw, (fan_in, fan_out), jnp.float32, -bound, bound)
        b = jax.random.uniform(kb, (1, fan_out), jnp.float32, -bound, bound)
        return w, b

    w1, b1 = linear(ks[0], ks[1], state_dim, hidden_size)
    w2, b2 = linear(ks[2], ks[3], hidden_size, hidden_size)
    # last layer weight overridden with uniform(-0.003, 0.003); bias keeps default
    w3 = jax.random.uniform(ks[4], (hidden_size, action_dim), jnp.float32, -0.003, 0.003)
    b3_bound = 1.0 / jnp.sqrt(hidden_size)
    b3 = jax.random.uniform(ks[5], (1, action_dim), jnp.float32, -b3_bound, b3_bound)

    gamma = jnp.ones((1, hidden_size), jnp.float32)   # LayerNorm weight
    beta = jnp.zeros((1, hidden_size), jnp.float32)   # LayerNorm bias

    return {"w1": w1, "b1": b1, "w2": w2, "b2": b2,
            "gamma": gamma, "beta": beta, "w3": w3, "b3": b3}


def actor_reference(state, params, temperature):
    """Pure-JAX reference (full-precision matmuls) for correctness check."""
    hp = jax.lax.Precision.HIGHEST
    h1 = jnp.maximum(jnp.dot(state, params["w1"], precision=hp) + params["b1"], 0.0)
    h2 = jnp.maximum(jnp.dot(h1, params["w2"], precision=hp) + params["b2"], 0.0)
    mean = jnp.mean(h2, axis=-1, keepdims=True)
    var = jnp.mean((h2 - mean) ** 2, axis=-1, keepdims=True)
    hn = (h2 - mean) / jnp.sqrt(var + 1e-5) * params["gamma"] + params["beta"]
    raw = (jnp.dot(hn, params["w3"], precision=hp) + params["b3"]) / temperature
    return raw, jnp.tanh(raw)


if __name__ == "__main__":
    key = jax.random.PRNGKey(0)
    k_param, k_state, k_big = jax.random.split(key, 3)

    state_dim, action_dim, hidden = 16, 8, 64
    temperature = 2.0

    params = init_actor_params(k_param, state_dim, action_dim, hidden)

    # Small batch (matches a typical per-agent call in the original code).
    state = jax.random.normal(k_state, (2, state_dim), jnp.float32)
    raw, act = actor_forward(state, params, temperature=temperature, return_raw=True)
    raw, act = jax.block_until_ready((raw, act))
    raw_ref, act_ref = actor_reference(state, params, temperature)
    assert raw.shape == (2, action_dim) and act.shape == (2, action_dim)
    assert jnp.allclose(raw, raw_ref, atol=1e-5, rtol=1e-5)
    assert jnp.allclose(act, act_ref, atol=1e-5, rtol=1e-5)

    # Larger batch exercises the pipelined / 2-TensorCore batch grid (2 x 256).
    big = jax.random.normal(k_big, (512, state_dim), jnp.float32)
    raw_b, act_b = actor_forward(big, params, temperature=temperature, return_raw=True)
    raw_b, act_b = jax.block_until_ready((raw_b, act_b))
    raw_bref, act_bref = actor_reference(big, params, temperature)
    assert jnp.allclose(raw_b, raw_bref, atol=1e-4, rtol=1e-4)
    assert jnp.allclose(act_b, act_bref, atol=1e-4, rtol=1e-4)

    # bf16-matmul path (works on v5e/v6e/v7x): looser tolerance, f32 epilogue.
    act_bf16 = actor_forward(big, params, temperature=temperature, use_bf16=True)
    act_bf16 = jax.block_until_ready(act_bf16)
    assert jnp.allclose(act_bf16, act_bref, atol=5e-2, rtol=5e-2)

    print("KERNEL_OK")
</pallas_src>

<mosaic_0001>
module attributes {stable_mosaic.version = 11 : i64} {
  func.func @_actor_kernel(%arg0: i32, %arg1: memref<8x16xf32, #tpu.memory_space<vmem>>, %arg2: memref<16x64xf32, #tpu.memory_space<vmem>>, %arg3: memref<1x64xf32, #tpu.memory_space<vmem>>, %arg4: memref<64x64xf32, #tpu.memory_space<vmem>>, %arg5: memref<1x64xf32, #tpu.memory_space<vmem>>, %arg6: memref<1x64xf32, #tpu.memory_space<vmem>>, %arg7: memref<1x64xf32, #tpu.memory_space<vmem>>, %arg8: memref<64x16xf32, #tpu.memory_space<vmem>>, %arg9: memref<1x16xf32, #tpu.memory_space<vmem>>, %arg10: memref<8x16xf32, #tpu.memory_space<vmem>>) attributes {dimension_semantics = [#tpu.dimension_semantics<parallel>], iteration_bounds = array<i64: 1>, scalar_prefetch = 0 : i64, scratch_operands = 0 : i64, tpu.core_type = #tpu.core_type<tc>, window_params = [{transform_indices = @transform_0, window_bounds = array<i64: 8, 16>}, {pipeline_mode = #tpu.pipeline_mode<synchronous>, transform_indices = @transform_1, window_bounds = array<i64: 16, 64>}, {pipeline_mode = #tpu.pipeline_mode<synchronous>, transform_indices = @transform_2, window_bounds = array<i64: 1, 64>}, {pipeline_mode = #tpu.pipeline_mode<synchronous>, transform_indices = @transform_3, window_bounds = array<i64: 64, 64>}, {pipeline_mode = #tpu.pipeline_mode<synchronous>, transform_indices = @transform_4, window_bounds = array<i64: 1, 64>}, {pipeline_mode = #tpu.pipeline_mode<synchronous>, transform_indices = @transform_5, window_bounds = array<i64: 1, 64>}, {pipeline_mode = #tpu.pipeline_mode<synchronous>, transform_indices = @transform_6, window_bounds = array<i64: 1, 64>}, {pipeline_mode = #tpu.pipeline_mode<synchronous>, transform_indices = @transform_7, window_bounds = array<i64: 64, 16>}, {pipeline_mode = #tpu.pipeline_mode<synchronous>, transform_indices = @transform_8, window_bounds = array<i64: 1, 16>}, {transform_indices = @transform_9, window_bounds = array<i64: 8, 16>}]} {
    %c0 = arith.constant 0 : index
    %c0_0 = arith.constant 0 : index
    %0 = vector.load %arg1[%c0, %c0_0] : memref<8x16xf32, #tpu.memory_space<vmem>>, vector<8x16xf32>
    %c0_1 = arith.constant 0 : index
    %c0_2 = arith.constant 0 : index
    %1 = vector.load %arg2[%c0_1, %c0_2] : memref<16x64xf32, #tpu.memory_space<vmem>>, vector<16x64xf32>
    %cst = arith.constant dense<0.000000e+00> : vector<8x64xf32>
    %2 = tpu.matmul %0, %1, %cst {dimension_numbers = #tpu.dot_dimension_numbers<[1], [0], [0], [1], [0, 0, 1, 1], [], []>, precision = #tpu.contract_precision<fp32>} : vector<8x16xf32>, vector<16x64xf32>, vector<8x64xf32> -> vector<8x64xf32>
    %c0_3 = arith.constant 0 : index
    %c0_4 = arith.constant 0 : index
    %3 = vector.load %arg3[%c0_3, %c0_4] : memref<1x64xf32, #tpu.memory_space<vmem>>, vector<1x64xf32>
    %4 = vector.broadcast %3 : vector<1x64xf32> to vector<8x64xf32>
    %5 = arith.addf %2, %4 : vector<8x64xf32>
    %cst_5 = arith.constant 0.000000e+00 : f32
    %6 = vector.broadcast %cst_5 : f32 to vector<8x64xf32>
    %7 = arith.maximumf %5, %6 : vector<8x64xf32>
    %c0_6 = arith.constant 0 : index
    %c0_7 = arith.constant 0 : index
    %8 = vector.load %arg4[%c0_6, %c0_7] : memref<64x64xf32, #tpu.memory_space<vmem>>, vector<64x64xf32>
    %cst_8 = arith.constant dense<0.000000e+00> : vector<8x64xf32>
    %9 = tpu.matmul %7, %8, %cst_8 {dimension_numbers = #tpu.dot_dimension_numbers<[1], [0], [0], [1], [0, 0, 1, 1], [], []>, precision = #tpu.contract_precision<fp32>} : vector<8x64xf32>, vector<64x64xf32>, vector<8x64xf32> -> vector<8x64xf32>
    %c0_9 = arith.constant 0 : index
    %c0_10 = arith.constant 0 : index
    %10 = vector.load %arg5[%c0_9, %c0_10] : memref<1x64xf32, #tpu.memory_space<vmem>>, vector<1x64xf32>
    %11 = vector.broadcast %10 : vector<1x64xf32> to vector<8x64xf32>
    %12 = arith.addf %9, %11 : vector<8x64xf32>
    %cst_11 = arith.constant 0.000000e+00 : f32
    %13 = vector.broadcast %cst_11 : f32 to vector<8x64xf32>
    %14 = arith.maximumf %12, %13 : vector<8x64xf32>
    %cst_12 = arith.constant 1.000000e+00 : f32
    %15 = vector.broadcast %cst_12 : f32 to vector<64x128xf32>
    %cst_13 = arith.constant dense<0.000000e+00> : vector<8x128xf32>
    %16 = tpu.matmul %14, %15, %cst_13 {dimension_numbers = #tpu.dot_dimension_numbers<[1], [0], [0], [1], [0, 0, 1, 1], [], []>, precision = #tpu.contract_precision<fp32>} : vector<8x64xf32>, vector<64x128xf32>, vector<8x128xf32> -> vector<8x128xf32>
    %17 = vector.extract_strided_slice %16 {offsets = [0, 0], sizes = [8, 64], strides = [1, 1]} : vector<8x128xf32> to vector<8x64xf32>
    %cst_14 = arith.constant 1.562500e-02 : f32
    %18 = vector.broadcast %cst_14 : f32 to vector<8x64xf32>
    %19 = arith.mulf %17, %18 : vector<8x64xf32>
    %20 = arith.subf %14, %19 : vector<8x64xf32>
    %21 = arith.mulf %20, %20 : vector<8x64xf32>
    %cst_15 = arith.constant dense<0.000000e+00> : vector<8x128xf32>
    %22 = tpu.matmul %21, %15, %cst_15 {dimension_numbers = #tpu.dot_dimension_numbers<[1], [0], [0], [1], [0, 0, 1, 1], [], []>, precision = #tpu.contract_precision<fp32>} : vector<8x64xf32>, vector<64x128xf32>, vector<8x128xf32> -> vector<8x128xf32>
    %23 = vector.extract_strided_slice %22 {offsets = [0, 0], sizes = [8, 64], strides = [1, 1]} : vector<8x128xf32> to vector<8x64xf32>
    %cst_16 = arith.constant 1.562500e-02 : f32
    %24 = vector.broadcast %cst_16 : f32 to vector<8x64xf32>
    %25 = arith.mulf %23, %24 : vector<8x64xf32>
    %cst_17 = arith.constant 9.99999974E-6 : f32
    %26 = vector.broadcast %cst_17 : f32 to vector<8x64xf32>
    %27 = arith.addf %25, %26 : vector<8x64xf32>
    %28 = math.rsqrt %27 : vector<8x64xf32>
    %29 = arith.mulf %20, %28 : vector<8x64xf32>
    %c0_18 = arith.constant 0 : index
    %c0_19 = arith.constant 0 : index
    %30 = vector.load %arg6[%c0_18, %c0_19] : memref<1x64xf32, #tpu.memory_space<vmem>>, vector<1x64xf32>
    %31 = vector.broadcast %30 : vector<1x64xf32> to vector<8x64xf32>
    %32 = arith.mulf %29, %31 : vector<8x64xf32>
    %c0_20 = arith.constant 0 : index
    %c0_21 = arith.constant 0 : index
    %33 = vector.load %arg7[%c0_20, %c0_21] : memref<1x64xf32, #tpu.memory_space<vmem>>, vector<1x64xf32>
    %34 = vector.broadcast %33 : vector<1x64xf32> to vector<8x64xf32>
    %35 = arith.addf %32, %34 : vector<8x64xf32>
    %c0_22 = arith.constant 0 : index
    %c0_23 = arith.constant 0 : index
    %36 = vector.load %arg8[%c0_22, %c0_23] : memref<64x16xf32, #tpu.memory_space<vmem>>, vector<64x16xf32>
    %cst_24 = arith.constant dense<0.000000e+00> : vector<8x16xf32>
    %37 = tpu.matmul %35, %36, %cst_24 {dimension_numbers = #tpu.dot_dimension_numbers<[1], [0], [0], [1], [0, 0, 1, 1], [], []>, precision = #tpu.contract_precision<fp32>} : vector<8x64xf32>, vector<64x16xf32>, vector<8x16xf32> -> vector<8x16xf32>
    %c0_25 = arith.constant 0 : index
    %c0_26 = arith.constant 0 : index
    %38 = vector.load %arg9[%c0_25, %c0_26] : memref<1x16xf32, #tpu.memory_space<vmem>>, vector<1x16xf32>
    %39 = vector.broadcast %38 : vector<1x16xf32> to vector<8x16xf32>
    %40 = arith.addf %37, %39 : vector<8x16xf32>
    %cst_27 = arith.constant 5.000000e-01 : f32
    %41 = vector.broadcast %cst_27 : f32 to vector<8x16xf32>
    %42 = arith.mulf %40, %41 : vector<8x16xf32>
    %43 = tpu.iota {dimensions = array<i32: 1>} : vector<8x16xi32>
    %c8_i32 = arith.constant 8 : i32
    %44 = vector.broadcast %c8_i32 : i32 to vector<8x16xi32>
    %45 = arith.cmpi slt, %43, %44 : vector<8x16xi32>
    %46 = math.tanh %42 : vector<8x16xf32>
    %47 = arith.select %45, %42, %46 : vector<8x16xi1>, vector<8x16xf32>
    %c0_28 = arith.constant 0 : index
    %c0_29 = arith.constant 0 : index
    %48 = vector.load %arg10[%c0_28, %c0_29] : memref<8x16xf32, #tpu.memory_space<vmem>>, vector<8x16xf32>
    tpu.vector_store %arg10[%c0_28, %c0_29], %47 {strides = array<i32>} : memref<8x16xf32, #tpu.memory_space<vmem>>, vector<8x16xf32>,
    return
  }
  func.func @transform_0(%arg0: i32) -> (i32, i32) {
    %c0_i32 = arith.constant 0 : i32
    %c0_i32_0 = arith.constant 0 : i32
    return %arg0, %c0_i32 : i32, i32
  }
  func.func @transform_1(%arg0: i32) -> (i32, i32) {
    %c0_i32 = arith.constant 0 : i32
    %c0_i32_0 = arith.constant 0 : i32
    %c0_i32_1 = arith.constant 0 : i32
    return %c0_i32, %c0_i32_0 : i32, i32
  }
  func.func @transform_2(%arg0: i32) -> (i32, i32) {
    %c0_i32 = arith.constant 0 : i32
    %c0_i32_0 = arith.constant 0 : i32
    %c0_i32_1 = arith.constant 0 : i32
    return %c0_i32, %c0_i32_0 : i32, i32
  }
  func.func @transform_3(%arg0: i32) -> (i32, i32) {
    %c0_i32 = arith.constant 0 : i32
    %c0_i32_0 = arith.constant 0 : i32
    %c0_i32_1 = arith.constant 0 : i32
    return %c0_i32, %c0_i32_0 : i32, i32
  }
  func.func @transform_4(%arg0: i32) -> (i32, i32) {
    %c0_i32 = arith.constant 0 : i32
    %c0_i32_0 = arith.constant 0 : i32
    %c0_i32_1 = arith.constant 0 : i32
    return %c0_i32, %c0_i32_0 : i32, i32
  }
  func.func @transform_5(%arg0: i32) -> (i32, i32) {
    %c0_i32 = arith.constant 0 : i32
    %c0_i32_0 = arith.constant 0 : i32
    %c0_i32_1 = arith.constant 0 : i32
    return %c0_i32, %c0_i32_0 : i32, i32
  }
  func.func @transform_6(%arg0: i32) -> (i32, i32) {
    %c0_i32 = arith.constant 0 : i32
    %c0_i32_0 = arith.constant 0 : i32
    %c0_i32_1 = arith.constant 0 : i32
    return %c0_i32, %c0_i32_0 : i32, i32
  }
  func.func @transform_7(%arg0: i32) -> (i32, i32) {
    %c0_i32 = arith.constant 0 : i32
    %c0_i32_0 = arith.constant 0 : i32
    %c0_i32_1 = arith.constant 0 : i32
    return %c0_i32, %c0_i32_0 : i32, i32
  }
  func.func @transform_8(%arg0: i32) -> (i32, i32) {
    %c0_i32 = arith.constant 0 : i32
    %c0_i32_0 = arith.constant 0 : i32
    %c0_i32_1 = arith.constant 0 : i32
    return %c0_i32, %c0_i32_0 : i32, i32
  }
  func.func @transform_9(%arg0: i32) -> (i32, i32) {
    %c0_i32 = arith.constant 0 : i32
    %c0_i32_0 = arith.constant 0 : i32
    return %arg0, %c0_i32 : i32, i32
  }
}

</mosaic_0001>

<bundles_post_ra>
// kernel: tpu_custom_call.1
= control target key start
LH: loop header
LB: loop body
LE: loop exit
PB: predicated region body
PF: predicated region fallthrough
CT: control target
= control target key end

     0   :  { %14 = vsyncpa [#allocation3], 0  ;;  %s1402_s0 = inlined_call_operand.hbm [shape: f32[8,16], index: 0, kind: input, shape index: {}]   ;;  %s1403_s1 = inlined_call_operand.vmem [shape: f32[16,64], index: 1, kind: input, shape index: {}]   ;;  %s1404_s2 = inlined_call_operand.vmem [shape: f32[1,64], index: 2, kind: input, shape index: {}]   ;;  %s1405_s3 = inlined_call_operand.vmem [shape: f32[64,64], index: 3, kind: input, shape index: {}]   ;;  %s1406_s4 = inlined_call_operand.vmem [shape: f32[1,64], index: 4, kind: input, shape index: {}]   ;;  %s1407_s5 = inlined_call_operand.vmem [shape: f32[1,64], index: 5, kind: input, shape index: {}]   ;;  %s1408_s6 = inlined_call_operand.vmem [shape: f32[1,64], index: 6, kind: input, shape index: {}]   ;;  %s1409_s7 = inlined_call_operand.vmem [shape: f32[64,16], index: 7, kind: input, shape index: {}]   ;;  %s1410_s8 = inlined_call_operand.vmem [shape: f32[1,16], index: 8, kind: input, shape index: {}]   ;;  %s1411_s9 = inlined_call_operand.hbm [shape: f32[8,16], index: 9, kind: output, shape index: {}]  }
   0x1   :  { %15 = vsyncpa [#allocation4], 0  ;;  %s21_s11 = sshll.u32 %s1402_s0, 4  ;;  %s1111_s12 = smov [#allocation2]   ;;  %s22_s11 = int_to_ptr.hbm [resolvable:$true] %s21_s11 }
   0x2   :  { %s23_s13 = sshll.u32 %s1111_s12, 4  ;;  %s24_s13 = int_to_ptr.vmem [resolvable:$true] %s23_s13 }
   0x3   :  { %26 = dma.hbm_to_vmem [thread:$0]  %s22_s11, 128, %s24_s13, [#allocation3]  }
   0x4   :  { %1107 = dma.done.wait [#allocation3], 128  }
   0x5   :  { %1108 = vsyncadd [#allocation3], 4294967168  ;;  %vm54_vm0 = vcmask 130048   ;;  %v49_v0 = vld [vmem:[%s1403_s1 + $0x8] sm:$0xff]  ;;  %v48_v1 = vld [vmem:[%s1403_s1] sm:$0xff]  ;;  %vm230_vm1 = vcmask 523264  }
   0x6   :  { %v47_v2 = vld [vmem:[#allocation2] sm:$0xff]  ;;  %v72_v3 = vand.u32 4294901760, %v49_v0  ;;  %v74_v4 = vand.u32 4294901760, %v48_v1  ;;  %v225_v6 = vld [vmem:[%s1405_s3 + $0x38] sm:$0xff]  ;;  %v224_v25 = vld [vmem:[%s1405_s3 + $0x30] sm:$0xff] }
   0x7   :  { %v56_v5 = vsel %vm54_vm0, %v47_v2, 0  ;;  %v1178_v8 = vand.u32 4294901760, %v225_v6  ;;  %v1193_v26 = vand.u32 4294901760, %v224_v25  ;;  %v223_v27 = vld [vmem:[%s1405_s3 + $0x28] sm:$0xff]  ;;  %v222_v30 = vld [vmem:[%s1405_s3 + $0x20] sm:$0xff]  ;;  %v221_v34 = vld [vmem:[%s1405_s3 + $0x18] sm:$0xff] }
   0x8   :  { %v76_v7 = vand.u32 4294901760, %v56_v5  ;;  %73 = vmatpush.msra.mxu3 %v72_v3  ;;  %v100_v9 = vsub.f32 %v49_v0, %v72_v3  ;;  %v106_v10 = vsub.f32 %v48_v1, %v74_v4  ;;  %v1201_v29 = vand.u32 4294901760, %v223_v27  ;;  %v220_v39 = vld [vmem:[%s1405_s3 + $0x10] sm:$0xff]  ;;  %v219_v45 = vld [vmem:[%s1405_s3 + $0x8] sm:$0xff]  ;;  %v218_v51 = vld [vmem:[%s1405_s3] sm:$0xff]  ;;  %s1036_s3 = sshll.u32 %s1411_s9, 4  ;;  %s1037_s3 = int_to_ptr.hbm [resolvable:$true] %s1036_s3 }
   0x9   :  { %v1181_v12 = vsub.f32 %v225_v6, %v1178_v8  ;;  %v1199_v28 = vsub.f32 %v224_v25, %v1193_v26  ;;  %v1210_v33 = vand.u32 4294901760, %v222_v30  ;;  %v1220_v38 = vand.u32 4294901760, %v221_v34  ;;  %v1051_v25 = vld [vmem:[%s1406_s4] ss:$0 sm:$0xff] }
   0xa   :  { %v77_v11 = vsub.f32 %v56_v5, %v76_v7  ;;  %75 = vmatpush.msra.mxu3 %v74_v4  ;;  %132 = vmatpush.msra.mxu2 %v100_v9  ;;  %v101_v13 = vand.u32 4294901760, %v100_v9  ;;  %v107_v14 = vand.u32 4294901760, %v106_v10  ;;  %v288_v32 = vsub.f32 %v223_v27, %v1201_v29 }
   0xb   :  { %v277_v16 = vand.u32 4294901760, %v1181_v12  ;;  %v283_v31 = vand.u32 4294901760, %v1199_v28  ;;  %v294_v37 = vsub.f32 %v222_v30, %v1210_v33  ;;  %v300_v43 = vsub.f32 %v221_v34, %v1220_v38 }
   0xc   :  { %v78_v15 = vand.u32 4294901760, %v77_v11  ;;  %157 = vmatpush.msrb.mxu3 %v72_v3  ;;  %135 = vmatpush.msra.mxu2 %v106_v10  ;;  %v102_v17 = vsub.f32 %v100_v9, %v101_v13  ;;  %v108_v18 = vsub.f32 %v106_v10, %v107_v14  ;;  %v289_v36 = vand.u32 4294901760, %v288_v32 }
   0xd   :  { %184 = vmatpush.msra.mxu0 %v101_v13  ;;  %138 = vmatmul.f32.vlgmr.msra.gmra.mxu2 %v77_v11  ;;  %v278_v20 = vsub.f32 %v1181_v12, %v277_v16  ;;  %v284_v35 = vsub.f32 %v1199_v28, %v283_v31  ;;  %v295_v42 = vand.u32 4294901760, %v294_v37  ;;  %v252_v44 = vand.u32 4294901760, %v220_v39 }
   0xe   :  { %v79_v19 = vsub.f32 %v77_v11, %v78_v15  ;;  %159 = vmatpush.msrb.mxu3 %v74_v4  ;;  %v103_v21 = vand.u32 4294901760, %v102_v17  ;;  %v109_v22 = vand.u32 4294901760, %v108_v18  ;;  %243 = vmatpush.msrb.mxu2 %v1178_v8  ;;  %v290_v41 = vsub.f32 %v288_v32, %v289_v36 }
   0xf   :  { %188 = vmatpush.msra.mxu0 %v107_v14  ;;  %v279_v24 = vand.u32 4294901760, %v278_v20  ;;  %v285_v40 = vand.u32 4294901760, %v284_v35  ;;  %v296_v47 = vsub.f32 %v294_v37, %v295_v42  ;;  %v301_v48 = vand.u32 4294901760, %v300_v43 }
  0x10   :  { %v80_v23 = vand.u32 4294901760, %v79_v19  ;;  %190 = vmatmul.f32.vlgmr.msra.gmra.mxu0 %v76_v7  ;;  %104 = vmatpush.msra.mxu1 %v103_v21  ;;  %v291_v46 = vand.u32 4294901760, %v290_v41  ;;  %v254_v49 = vand.u32 4294901760, %v219_v45  ;;  %v306_v50 = vsub.f32 %v220_v39, %v252_v44 }
  0x11   :  { %338 = vmatpush.msrb.mxu0 %v1181_v12  ;;  %245 = vmatpush.msrb.mxu2 %v1193_v26  ;;  %v297_v52 = vand.u32 4294901760, %v296_v47  ;;  %v302_v53 = vsub.f32 %v300_v43, %v301_v48  ;;  %v256_v55 = vand.u32 4294901760, %v218_v51 }
  0x12   :  { %81 = vmatmul.f32.vlgmr.msra.gmra.mxu3 %v80_v23  ;;  %110 = vmatpush.msra.mxu1 %v109_v22  ;;  %v312_v54 = vsub.f32 %v219_v45, %v254_v49  ;;  %v307_v56 = vand.u32 4294901760, %v306_v50  ;;  %v1112_v23 = vmov 1.0  }
  0x13   :  { %280 = vmatpush.msra.mxu3 %v279_v24  ;;  %112 = vmatmul.f32.vlgmr.msra.gmra.mxu1 %v76_v7  ;;  %v303_v57 = vand.u32 4294901760, %v302_v53  ;;  %v318_v59 = vsub.f32 %v218_v51, %v256_v55  ;;  %v1113_v24 = vmov 0.0  }
  0x14   :  { %209 = vmatpush.msrb.mxu1 %v72_v3  ;;  %341 = vmatpush.msrb.mxu0 %v1199_v28  ;;  %v313_v58 = vand.u32 4294901760, %v312_v54  ;;  %v308_v60 = vsub.f32 %v306_v50, %v307_v56  ;;  %v1050_v3 = vld [vmem:[%s1404_s2] ss:$0 sm:$0xff] }
  0x15   :  { %247 = vmatpush.msrb.mxu2 %v1201_v29  ;;  %286 = vmatpush.msra.mxu3 %v285_v40  ;;  %v319_v62 = vand.u32 4294901760, %v318_v59 }
  0x16   :  { %211 = vmatpush.msrb.mxu1 %v74_v4  ;;  %344 = vmatpush.msrb.mxu0 %v288_v32  ;;  %v314_v61 = vsub.f32 %v312_v54, %v313_v58  ;;  %v309_v63 = vand.u32 4294901760, %v308_v60 }
  0x17   :  { %249 = vmatpush.msrb.mxu2 %v1210_v33  ;;  %292 = vmatpush.msra.mxu3 %v291_v46  ;;  %v320_v1 = vsub.f32 %v318_v59, %v319_v62 }
  0x18   :  { %375 = vmatpush.msra.mxu1 %v1178_v8  ;;  %347 = vmatpush.msrb.mxu0 %v294_v37  ;;  %v315_v0 = vand.u32 4294901760, %v314_v61 }
  0x19   :  { %251 = vmatpush.msrb.mxu2 %v1220_v38  ;;  %298 = vmatpush.msra.mxu3 %v297_v52  ;;  %v321_v2 = vand.u32 4294901760, %v320_v1  ;;  %v777_v1 = vld [vmem:[%s1409_s7 + $0x38] sm:$0xff] }
  0x1a   :  { %163 = vmatmul.f32.vlgmr.msrb.gmra.mxu3 %v78_v15  ;;  %377 = vmatpush.msra.mxu1 %v1193_v26 }
  0x1b   :  { %213 = vmatmul.f32.vlgmr.msrb.gmra.mxu1 %v76_v7  ;;  %350 = vmatpush.msrb.mxu0 %v300_v43 }
  0x1c   :  { %379 = vmatpush.msra.mxu1 %v1201_v29  ;;  %253 = vmatpush.msrb.mxu2 %v252_v44 }
  0x1d   :  { %353 = vmatpush.msrb.mxu0 %v306_v50  ;;  %304 = vmatpush.msra.mxu3 %v303_v57 }
  0x1e   :  { %381 = vmatpush.msra.mxu1 %v1210_v33  ;;  %255 = vmatpush.msrb.mxu2 %v254_v49 }
  0x1f   :  { %356 = vmatpush.msrb.mxu0 %v312_v54  ;;  %310 = vmatpush.msra.mxu3 %v309_v63 }
  0x20   :  { %383 = vmatpush.msra.mxu1 %v1220_v38  ;;  %257 = vmatpush.msrb.mxu2 %v256_v55 }
  0x21   :  { %359 = vmatpush.msrb.mxu0 %v318_v59  ;;  %316 = vmatpush.msra.mxu3 %v315_v0 }
  0x22   :  { %385 = vmatpush.msra.mxu1 %v252_v44  ;;  %408 = vmatpush.msra.mxu2 %v277_v16 }
  0x23   :  { %322 = vmatpush.msra.mxu3 %v321_v2  ;;  %483 = vmatpush.msra.mxu0 %v1112_v23  ;;  %v1307_v2 = vand.u32 4294901760, %v777_v1 }
  0x24   :  { %387 = vmatpush.msra.mxu1 %v254_v49  ;;  %412 = vmatpush.msra.mxu2 %v283_v31 }
  0x25   :  { %451 = vmatpush.msrb.mxu3 %v1178_v8  ;;  %484 = vmatpush.msra.mxu0 %v1112_v23 }
  0x26   :  { %389 = vmatpush.msra.mxu1 %v256_v55  ;;  %416 = vmatpush.msra.mxu2 %v289_v36 }
  0x27   :  { %453 = vmatpush.msrb.mxu3 %v1193_v26  ;;  %485 = vmatpush.msra.mxu0 %v1112_v23 }
  0x28   :  { %420 = vmatpush.msra.mxu2 %v295_v42  ;;  %515 = vmatpush.msrb.mxu1 %v1113_v24 }
  0x29   :  { %455 = vmatpush.msrb.mxu3 %v1201_v29  ;;  %486 = vmatpush.msra.mxu0 %v1112_v23 }
  0x2a   :  { %424 = vmatpush.msra.mxu2 %v301_v48 }
  0x2b   :  { %457 = vmatpush.msrb.mxu3 %v1210_v33  ;;  %487 = vmatpush.msra.mxu0 %v1112_v23 }
  0x2c   :  { %428 = vmatpush.msra.mxu2 %v307_v56 }
  0x2d   :  { %459 = vmatpush.msrb.mxu3 %v1220_v38  ;;  %488 = vmatpush.msra.mxu0 %v1112_v23 }
  0x2e   :  { %432 = vmatpush.msra.mxu2 %v313_v58 }
  0x2f   :  { %461 = vmatpush.msrb.mxu3 %v252_v44  ;;  %489 = vmatpush.msra.mxu0 %v1112_v23 }
  0x30   :  { %436 = vmatpush.msra.mxu2 %v319_v62 }
  0x31   :  { %463 = vmatpush.msrb.mxu3 %v254_v49  ;;  %490 = vmatpush.msra.mxu0 %v1112_v23 }
  0x33   :  { %465 = vmatpush.msrb.mxu3 %v256_v55 }
  0x8d   :  { %v191_v11 = vpop.f32.mrf.mxu0 }
  0x90   :  { %v113_v5 = vpop.f32.mrf.mxu1  ;;  %v139_v8 = vpop.f32.mrf.mxu2 }
  0x95   :  { %v82_v4 = vpop.f32.mrf.mxu3 }
  0x96   :  { %v83_v6 = vadd.f32 %v1050_v3, %v82_v4  ;;  %v776_v3 = vld [vmem:[%s1409_s7 + $0x30] sm:$0xff]  ;;  %v1313_v4 = vsub.f32 %v777_v1, %v1307_v2 }
  0x98   :  { %v114_v7 = vadd.f32 %v113_v5, %v83_v6  ;;  %v214_v13 = vpop.f32.mrf.mxu1  ;;  %v1315_v5 = vand.u32 4294901760, %v776_v3  ;;  %v775_v6 = vld [vmem:[%s1409_s7 + $0x28] sm:$0xff] }
  0x9a   :  { %v140_v9 = vadd.f32 %v139_v8, %v114_v7  ;;  %v828_v7 = vand.u32 4294901760, %v1313_v4  ;;  %v1324_v8 = vsub.f32 %v776_v3, %v1315_v5 }
  0x9d   :  { %v164_v10 = vpop.f32.mrf.mxu3 }
  0x9e   :  { %v165_v12 = vadd.f32 %v164_v10, %v140_v9  ;;  %v1326_v9 = vand.u32 4294901760, %v775_v6  ;;  %v774_v10 = vld [vmem:[%s1409_s7 + $0x20] sm:$0xff] }
  0xa0   :  { %v192_v14 = vadd.f32 %v191_v11, %v165_v12  ;;  %v829_v11 = vsub.f32 %v1313_v4, %v828_v7  ;;  %v834_v12 = vand.u32 4294901760, %v1324_v8 }
  0xa2   :  { %v215_v15 = vadd.f32 %v214_v13, %v192_v14  ;;  %v1339_v13 = vsub.f32 %v775_v6, %v1326_v9  ;;  %v1341_v14 = vand.u32 4294901760, %v774_v10 }
  0xa4   :  { %v217_v16 = vmax.f32 %v215_v15, 0.0  ;;  %v773_v15 = vld [vmem:[%s1409_s7 + $0x18] sm:$0xff] }
  0xa6   :  { %v232_v17 = vsel %vm230_vm1, %v217_v16, 0  ;;  %v830_v16 = vand.u32 4294901760, %v829_v11 }
  0xa7   :  { %v258_v18 = vand.u32 4294901760, %v232_v17 }
  0xa9   :  { %324 = vmatmul.f32.vlgmr.msra.gmra.mxu3 %v258_v18  ;;  %v259_v19 = vsub.f32 %v232_v17, %v258_v18  ;;  %v835_v17 = vsub.f32 %v1324_v8, %v834_v12 }
  0xaa   :  { %581 = vmatpush.msra.mxu3 %v1113_v24 }
  0xab   :  { %362 = vmatmul.f32.vlgmr.msrb.gmra.mxu0 %v259_v19  ;;  %v260_v20 = vand.u32 4294901760, %v259_v19 }
  0xac   :  { %595 = vmatpush.msrb.mxu0 %v1112_v23 }
  0xad   :  { %393 = vmatmul.f32.vlgmr.msra.gmra.mxu1 %v260_v20  ;;  %v261_v21 = vsub.f32 %v259_v19, %v260_v20  ;;  %v845_v19 = vsub.f32 %v774_v10, %v1341_v14  ;;  %v1356_v20 = vand.u32 4294901760, %v773_v15 }
  0xae   :  { %536 = vmatpush.msra.mxu1 %v1113_v24  ;;  %596 = vmatpush.msrb.mxu0 %v1112_v23 }
  0xaf   :  { %v262_v22 = vand.u32 4294901760, %v261_v21  ;;  %v772_v21 = vld [vmem:[%s1409_s7 + $0x10] sm:$0xff] }
  0xb0   :  { %597 = vmatpush.msrb.mxu0 %v1112_v23 }
  0xb1   :  { %263 = vmatmul.f32.vlgmr.msrb.gmra.mxu2 %v262_v22  ;;  %467 = vmatmul.f32.vlgmr.msrb.gmra.mxu3 %v258_v18  ;;  %v836_v22 = vand.u32 4294901760, %v835_v17 }
  0xb2   :  { %551 = vmatpush.msrb.mxu2 %v1112_v23  ;;  %654 = vmatpush.msrb.mxu3 %v1113_v24 }
  0xb3   :  { %598 = vmatpush.msrb.mxu0 %v1112_v23 }
  0xb4   :  { %552 = vmatpush.msrb.mxu2 %v1112_v23 }
  0xb5   :  { %599 = vmatpush.msrb.mxu0 %v1112_v23 }
  0xb6   :  { %553 = vmatpush.msrb.mxu2 %v1112_v23 }
  0xb7   :  { %600 = vmatpush.msrb.mxu0 %v1112_v23 }
  0xb8   :  { %554 = vmatpush.msrb.mxu2 %v1112_v23 }
  0xb9   :  { %438 = vmatmul.f32.vlgmr.msra.gmra.mxu2 %v258_v18  ;;  %601 = vmatpush.msrb.mxu0 %v1112_v23  ;;  %v840_v18 = vand.u32 4294901760, %v1339_v13 }
  0xba   :  { %555 = vmatpush.msrb.mxu2 %v1112_v23 }
  0xbb   :  { %602 = vmatpush.msrb.mxu0 %v1112_v23 }
  0xbc   :  { %556 = vmatpush.msrb.mxu2 %v1112_v23 }
  0xbe   :  { %557 = vmatpush.msrb.mxu2 %v1112_v23 }
  0xc0   :  { %558 = vmatpush.msrb.mxu2 %v1112_v23 }
  0xc2   :  { %675 = vmatpush.msra.mxu2 %v1113_v24 }
 0x128   :  { %v363_v30 = vpop.f32.mrf.mxu0 }
 0x12a   :  { %v394_v32 = vpop.f32.mrf.mxu1 }
 0x12c   :  { %v325_v26 = vpop.f32.mrf.mxu3 }
 0x134   :  { %v264_v27 = vpop.f32.mrf.mxu2  ;;  %v468_v36 = vpop.f32.mrf.mxu3 }
 0x135   :  { %v265_v28 = vadd.f32 %v1051_v25, %v264_v27  ;;  %v1363_v25 = vand.u32 4294901760, %v772_v21  ;;  %v771_v27 = vld [vmem:[%s1409_s7 + $0x8] sm:$0xff] }
 0x137   :  { %v326_v29 = vadd.f32 %v325_v26, %v265_v28  ;;  %v851_v26 = vsub.f32 %v773_v15, %v1356_v20 }
 0x139   :  { %v364_v31 = vadd.f32 %v363_v30, %v326_v29  ;;  %v857_v30 = vsub.f32 %v772_v21, %v1363_v25 }
 0x13b   :  { %v395_v33 = vadd.f32 %v394_v32, %v364_v31  ;;  %v805_v31 = vand.u32 4294901760, %v771_v27  ;;  %v852_v32 = vand.u32 4294901760, %v851_v26 }
 0x13c   :  { %v439_v34 = vpop.f32.mrf.mxu2 }
 0x13d   :  { %v440_v35 = vadd.f32 %v439_v34, %v395_v33  ;;  %v770_v33 = vld [vmem:[%s1409_s7] sm:$0xff] }
 0x13f   :  { %v469_v37 = vadd.f32 %v468_v36, %v440_v35  ;;  %v858_v35 = vand.u32 4294901760, %v857_v30  ;;  %v863_v36 = vsub.f32 %v771_v27, %v805_v31 }
 0x141   :  { %v471_v38 = vmax.f32 %v469_v37, 0.0  ;;  %v807_v37 = vand.u32 4294901760, %v770_v33 }
 0x143   :  { %v473_v39 = vsel %vm230_vm1, %v471_v38, 0 }
 0x144   :  { %v491_v40 = vand.u32 4294901760, %v473_v39 }
 0x146   :  { %v492_v41 = vsub.f32 %v473_v39, %v491_v40  ;;  %517 = vmatmul.f32.vlgmr.msrb.gmra.mxu1 %v491_v40  ;;  %583 = vmatmul.f32.vlgmr.msra.gmra.mxu3 %v491_v40  ;;  %v859_v39 = vsub.f32 %v857_v30, %v858_v35 }
 0x147   :  { %622 = vmatpush.msrb.mxu1 %v1112_v23  ;;  %690 = vmatpush.msra.mxu3 %v1112_v23 }
 0x148   :  { %v493_v42 = vand.u32 4294901760, %v492_v41 }
 0x149   :  { %623 = vmatpush.msrb.mxu1 %v1112_v23  ;;  %691 = vmatpush.msra.mxu3 %v1112_v23 }
 0x14a   :  { %562 = vmatmul.f32.vlgmr.msrb.gmra.mxu2 %v493_v42  ;;  %v494_v43 = vsub.f32 %v492_v41, %v493_v42 }
 0x14b   :  { %624 = vmatpush.msrb.mxu1 %v1112_v23  ;;  %692 = vmatpush.msra.mxu3 %v1112_v23 }
 0x14c   :  { %v495_v44 = vand.u32 4294901760, %v494_v43  ;;  %794 = vmatpush.msrb.mxu2 %v1307_v2 }
 0x14d   :  { %625 = vmatpush.msrb.mxu1 %v1112_v23  ;;  %693 = vmatpush.msra.mxu3 %v1112_v23 }
 0x14e   :  { %496 = vmatmul.f32.vlgmr.msra.gmra.mxu0 %v495_v44  ;;  %539 = vmatmul.f32.vlgmr.msra.gmra.mxu1 %v492_v41  ;;  %v869_v41 = vsub.f32 %v770_v33, %v807_v37  ;;  %v860_v44 = vand.u32 4294901760, %v859_v39 }
 0x14f   :  { %626 = vmatpush.msrb.mxu1 %v1112_v23  ;;  %720 = vmatpush.msra.mxu0 %v1113_v24  ;;  %v846_v24 = vand.u32 4294901760, %v845_v19 }
 0x150   :  { %694 = vmatpush.msra.mxu3 %v1112_v23  ;;  %796 = vmatpush.msrb.mxu2 %v1315_v5 }
 0x151   :  { %627 = vmatpush.msrb.mxu1 %v1112_v23  ;;  %v847_v29 = vsub.f32 %v845_v19, %v846_v24 }
 0x152   :  { %695 = vmatpush.msra.mxu3 %v1112_v23  ;;  %798 = vmatpush.msrb.mxu2 %v1326_v9 }
 0x153   :  { %628 = vmatpush.msrb.mxu1 %v1112_v23  ;;  %v848_v34 = vand.u32 4294901760, %v847_v29  ;;  %v1023_v29 = vlaneseq }
 0x154   :  { %696 = vmatpush.msra.mxu3 %v1112_v23  ;;  %800 = vmatpush.msrb.mxu2 %v1341_v14 }
 0x155   :  { %629 = vmatpush.msrb.mxu1 %v1112_v23 }
 0x156   :  { %604 = vmatmul.f32.vlgmr.msrb.gmra.mxu0 %v491_v40  ;;  %697 = vmatpush.msra.mxu3 %v1112_v23  ;;  %v864_v40 = vand.u32 4294901760, %v863_v36 }
 0x157   :  { %734 = vmatpush.msra.mxu1 %v1112_v23  ;;  %831 = vmatpush.msrb.mxu0 %v830_v16 }
 0x158   :  { %802 = vmatpush.msrb.mxu2 %v1356_v20 }
 0x159   :  { %735 = vmatpush.msra.mxu1 %v1112_v23  ;;  %837 = vmatpush.msrb.mxu0 %v836_v22 }
 0x15a   :  { %804 = vmatpush.msrb.mxu2 %v1363_v25 }
 0x15b   :  { %736 = vmatpush.msra.mxu1 %v1112_v23 }
 0x15c   :  { %806 = vmatpush.msrb.mxu2 %v805_v31 }
 0x15d   :  { %737 = vmatpush.msra.mxu1 %v1112_v23 }
 0x15e   :  { %808 = vmatpush.msrb.mxu2 %v807_v37 }
 0x15f   :  { %738 = vmatpush.msra.mxu1 %v1112_v23 }
 0x161   :  { %739 = vmatpush.msra.mxu1 %v1112_v23 }
 0x163   :  { %740 = vmatpush.msra.mxu1 %v1112_v23 }
 0x165   :  { %741 = vmatpush.msra.mxu1 %v1112_v23  ;;  %v841_v23 = vsub.f32 %v1339_v13, %v840_v18 }
 0x167   :  { %v842_v28 = vand.u32 4294901760, %v841_v23 }
 0x169   :  { %843 = vmatpush.msrb.mxu0 %v842_v28 }
 0x16b   :  { %849 = vmatpush.msrb.mxu0 %v848_v34 }
 0x1c3   :  { %v518_v45 = vpop.f32.mrf.mxu1 }
 0x1c9   :  { %v584_v52 = vpop.f32.mrf.mxu3 }
 0x1cb   :  { %v497_v46 = vpop.f32.mrf.mxu0  ;;  %v540_v48 = vpop.f32.mrf.mxu1 }
 0x1cc   :  { %v519_v47 = vadd.f32 %v518_v45, %v497_v46  ;;  %v865_v45 = vsub.f32 %v863_v36, %v864_v40  ;;  %v870_v46 = vand.u32 4294901760, %v869_v41 }
 0x1cd   :  { %v563_v50 = vpop.f32.mrf.mxu2 }
 0x1ce   :  { %v541_v49 = vadd.f32 %v540_v48, %v519_v47  ;;  %v866_v48 = vand.u32 4294901760, %v865_v45 }
 0x1d0   :  { %v564_v51 = vadd.f32 %v563_v50, %v541_v49  ;;  %v871_v49 = vsub.f32 %v869_v41, %v870_v46 }
 0x1d2   :  { %v585_v53 = vadd.f32 %v584_v52, %v564_v51  ;;  %v872_v51 = vand.u32 4294901760, %v871_v49 }
 0x1d3   :  { %v605_v54 = vpop.f32.mrf.mxu0 }
 0x1d4   :  { %v606_v55 = vadd.f32 %v605_v54, %v585_v53 }
 0x1d6   :  { %v608_v56 = vmul.f32 0.015625, %v606_v55 }
 0x1d8   :  { %v1299_v57 = vsub.f32 %v471_v38, %v608_v56  ;;  %v853_v38 = vsub.f32 %v851_v26, %v852_v32 }
 0x1da   :  { %v610_v58 = vmul.f32 %v1299_v57, %v1299_v57  ;;  %v854_v42 = vand.u32 4294901760, %v853_v38 }
 0x1dc   :  { %v612_v59 = vsel %vm230_vm1, %v610_v58, 0  ;;  %855 = vmatpush.msrb.mxu0 %v854_v42 }
 0x1dd   :  { %v630_v60 = vand.u32 4294901760, %v612_v59 }
 0x1de   :  { %861 = vmatpush.msrb.mxu0 %v860_v44 }
 0x1df   :  { %656 = vmatmul.f32.vlgmr.msrb.gmra.mxu3 %v630_v60  ;;  %722 = vmatmul.f32.vlgmr.msra.gmra.mxu0 %v630_v60  ;;  %v631_v61 = vsub.f32 %v612_v59, %v630_v60 }
 0x1e0   :  { %889 = vmatpush.msrb.mxu3 %v1313_v4  ;;  %867 = vmatpush.msrb.mxu0 %v866_v48 }
 0x1e1   :  { %678 = vmatmul.f32.vlgmr.msra.gmra.mxu2 %v631_v61  ;;  %v632_v62 = vand.u32 4294901760, %v631_v61 }
 0x1e2   :  { %892 = vmatpush.msrb.mxu3 %v1324_v8  ;;  %959 = vmatpush.msra.mxu2 %v828_v7  ;;  %v1053_v8 = vld [vmem:[%s1408_s6] ss:$0 sm:$0xff]  ;;  %s1114_s6 = smov [#allocation5]  }
 0x1e3   :  { %v633_v63 = vsub.f32 %v631_v61, %v632_v62  ;;  %873 = vmatpush.msrb.mxu0 %v872_v51  ;;  %s1034_s30 = sshll.u32 %s1114_s6, 4  ;;  %s1035_s30 = int_to_ptr.vmem [resolvable:$true] %s1034_s30 }
 0x1e4   :  { %895 = vmatpush.msrb.mxu3 %v1339_v13  ;;  %963 = vmatpush.msra.mxu2 %v834_v12 }
 0x1e5   :  { %v634_v0 = vand.u32 4294901760, %v633_v63  ;;  %1002 = vmatpush.msra.mxu0 %v1307_v2 }
 0x1e6   :  { %898 = vmatpush.msrb.mxu3 %v845_v19  ;;  %967 = vmatpush.msra.mxu2 %v840_v18 }
 0x1e7   :  { %635 = vmatmul.f32.vlgmr.msrb.gmra.mxu1 %v634_v0  ;;  %701 = vmatmul.f32.vlgmr.msra.gmra.mxu3 %v632_v62 }
 0x1e8   :  { %926 = vmatpush.msrb.mxu1 %v1307_v2  ;;  %901 = vmatpush.msrb.mxu3 %v851_v26 }
 0x1e9   :  { %971 = vmatpush.msra.mxu2 %v846_v24  ;;  %1004 = vmatpush.msra.mxu0 %v1315_v5 }
 0x1ea   :  { %928 = vmatpush.msrb.mxu1 %v1315_v5  ;;  %904 = vmatpush.msrb.mxu3 %v857_v30  ;;  %v1052_v5 = vld [vmem:[%s1407_s5] ss:$0 sm:$0xff] }
 0x1eb   :  { %975 = vmatpush.msra.mxu2 %v852_v32  ;;  %1006 = vmatpush.msra.mxu0 %v1326_v9 }
 0x1ec   :  { %930 = vmatpush.msrb.mxu1 %v1326_v9  ;;  %907 = vmatpush.msrb.mxu3 %v863_v36 }
 0x1ed   :  { %979 = vmatpush.msra.mxu2 %v858_v35  ;;  %1008 = vmatpush.msra.mxu0 %v1341_v14 }
 0x1ee   :  { %932 = vmatpush.msrb.mxu1 %v1341_v14  ;;  %910 = vmatpush.msrb.mxu3 %v869_v41 }
 0x1ef   :  { %743 = vmatmul.f32.vlgmr.msra.gmra.mxu1 %v630_v60  ;;  %983 = vmatpush.msra.mxu2 %v864_v40 }
 0x1f0   :  { %934 = vmatpush.msrb.mxu1 %v1356_v20  ;;  %1010 = vmatpush.msra.mxu0 %v1356_v20 }
 0x1f1   :  { %987 = vmatpush.msra.mxu2 %v870_v46 }
 0x1f2   :  { %936 = vmatpush.msrb.mxu1 %v1363_v25  ;;  %1012 = vmatpush.msra.mxu0 %v1363_v25 }
 0x1f4   :  { %938 = vmatpush.msrb.mxu1 %v805_v31  ;;  %1014 = vmatpush.msra.mxu0 %v805_v31  ;;  %v1024_v31 = vand.u32 127, %v1023_v29 }
 0x1f6   :  { %940 = vmatpush.msrb.mxu1 %v807_v37  ;;  %1016 = vmatpush.msra.mxu0 %v807_v37  ;;  %vm1025_vm5 = vcmp.lt.s32.totalorder %v1024_v31, 8 }
 0x25c   :  { %v723_v56 = vpop.f32.mrf.mxu0 }
 0x262   :  { %v657_v43 = vpop.f32.mrf.mxu3 }
 0x264   :  { %v636_v47 = vpop.f32.mrf.mxu1  ;;  %v679_v52 = vpop.f32.mrf.mxu2 }
 0x265   :  { %v658_v50 = vadd.f32 %v657_v43, %v636_v47 }
 0x267   :  { %v680_v53 = vadd.f32 %v679_v52, %v658_v50 }
 0x26a   :  { %v702_v54 = vpop.f32.mrf.mxu3 }
 0x26b   :  { %v703_v55 = vadd.f32 %v702_v54, %v680_v53 }
 0x26c   :  { %v744_v59 = vpop.f32.mrf.mxu1 }
 0x26d   :  { %v724_v58 = vadd.f32 %v723_v56, %v703_v55 }
 0x26f   :  { %v745_v60 = vadd.f32 %v744_v59, %v724_v58 }
 0x271   :  { %v747_v61 = vmul.f32 0.015625, %v745_v60 }
 0x273   :  { %v748_v62 = vadd.f32 1e-05, %v747_v61 }
 0x275   :  { %1055 = vrsqrt.f32 %v748_v62  ;;  %vm755_vm3 = vweird.f32 %v748_v62 }
 0x27b   :  { %v1056_v63 = vpop.eup %1055 }
 0x27c   :  { %v750_v0 = vmul.f32 %v1056_v63, %v748_v62  ;;  %vm756_vm2 = vweird.f32 %v1056_v63 }
 0x27d   :  { %vm757_vm4 = vmor %vm755_vm3, %vm756_vm2 }
 0x27e   :  { %v751_v1 = vmul.f32 %v1056_v63, %v750_v0 }
 0x280   :  { %v752_v2 = vmul.f32 0.5, %v751_v1 }
 0x282   :  { %v753_v3 = vsub.f32 1.5, %v752_v2 }
 0x284   :  { %v754_v4 = vmul.f32 %v1056_v63, %v753_v3 }
 0x286   :  { %v758_v6 = vsel %vm757_vm4, %v1056_v63, %v754_v4 }
 0x287   :  { %v759_v7 = vmul.f32 %v758_v6, %v1299_v57  ;;  %v1054_v57 = vld [vmem:[%s1410_s8] ss:$0 sm:$0xff] }
 0x289   :  { %v764_v9 = vmul.f32 %v1052_v5, %v759_v7 }
 0x28b   :  { %v769_v10 = vadd.f32 %v1053_v8, %v764_v9 }
 0x28d   :  { %v783_v11 = vsel %vm230_vm1, %v769_v10, 0 }
 0x28e   :  { %v809_v12 = vand.u32 4294901760, %v783_v11 }
 0x290   :  { %875 = vmatmul.f32.vlgmr.msrb.gmra.mxu0 %v809_v12  ;;  %v810_v13 = vsub.f32 %v783_v11, %v809_v12 }
 0x292   :  { %913 = vmatmul.f32.vlgmr.msrb.gmra.mxu3 %v810_v13  ;;  %v811_v14 = vand.u32 4294901760, %v810_v13 }
 0x294   :  { %944 = vmatmul.f32.vlgmr.msrb.gmra.mxu1 %v811_v14  ;;  %v812_v15 = vsub.f32 %v810_v13, %v811_v14 }
 0x296   :  { %v813_v16 = vand.u32 4294901760, %v812_v15 }
 0x298   :  { %814 = vmatmul.f32.vlgmr.msrb.gmra.mxu2 %v813_v16  ;;  %1018 = vmatmul.f32.vlgmr.msra.gmra.mxu0 %v809_v12 }
 0x2a0   :  { %989 = vmatmul.f32.vlgmr.msra.gmra.mxu2 %v809_v12 }
 0x30d   :  { %v876_v17 = vpop.f32.mrf.mxu0 }
 0x311   :  { %v945_v23 = vpop.f32.mrf.mxu1 }
 0x315   :  { %v914_v21 = vpop.f32.mrf.mxu3  ;;  %v1019_v27 = vpop.f32.mrf.mxu0 }
 0x31b   :  { %v815_v18 = vpop.f32.mrf.mxu2 }
 0x31c   :  { %v816_v19 = vadd.f32 %v1054_v57, %v815_v18 }
 0x31e   :  { %v877_v20 = vadd.f32 %v876_v17, %v816_v19 }
 0x320   :  { %v915_v22 = vadd.f32 %v914_v21, %v877_v20 }
 0x322   :  { %v946_v24 = vadd.f32 %v945_v23, %v915_v22 }
 0x323   :  { %v990_v25 = vpop.f32.mrf.mxu2 }
 0x324   :  { %v991_v26 = vadd.f32 %v990_v25, %v946_v24 }
 0x326   :  { %v1020_v28 = vadd.f32 %v1019_v27, %v991_v26 }
 0x328   :  { %v1022_v30 = vmul.f32 0.5, %v1020_v28 }
 0x32a   :  { %1057 = vtanh.f32 %v1022_v30 }
 0x330   :  { %v1058_v32 = vpop.eup %1057 }
 0x331   :  { %v1027_v33 = vsel %vm1025_vm5, %v1022_v30, %v1058_v32 }
 0x332   :  { %1028 = vst.msk [vmem:[#allocation5] sm:$0xff] %vm54_vm0, %v1027_v33 }
 0x333   :  { %1039 = dma.vmem_to_hbm [thread:$0]  %s1035_s30, 128, %s1037_s3, [#allocation4]  }
 0x334   :  { %1109 = dma.done.wait [#allocation4], 128  }
 0x335   :  { %1110 = vsyncadd [#allocation4], 4294967168 }
 0x336   :  { %1044 = vsyncpa [#allocation3], 1 }
 0x337   :  { %1045 = vsyncpa [#allocation4], 1 }

</bundles_post_ra>
